<compile_context>
chip_gen: v5e
topology: v5e:2x2
jax: 0.10.0
libtpu: 0.0.40
codegen_flags: <defaults>
</compile_context>

<pallas_src>
import math

import jax
import jax.numpy as jnp
from jax.experimental import pallas as pl
from jax.experimental.pallas import tpu as pltpu


_PER_BUFFER_BYTES = 2 * 1024 * 1024   # ~2 MiB/tile buffer, see header comment
_SMALL_BYTES = 64 * 1024              # below this, launch overhead dominates


def _cdiv(a: int, b: int) -> int:
    return -(-a // b)


def _round_up(a: int, b: int) -> int:
    return _cdiv(a, b) * b


def _sublane_multiple(dtype) -> int:
    # f32 -> 8, bf16 -> 16, int8/fp8 -> 32 (sub-32-bit dtypes pack along sublanes).
    return max(8, 32 // jnp.dtype(dtype).itemsize)


def _add_bias_kernel(x_ref, b_ref, o_ref):
    # x_ref: (tile_rows, tile_cols) tile in VMEM; b_ref: (1, tile_cols) bias
    # slice (VMEM-resident across row steps). Broadcast-add on the VPU.
    o_ref[...] = x_ref[...] + b_ref[...]


def _choose_tiles(rows: int, width: int, dtype) -> tuple[int, int]:
    """Pick (tile_rows, tile_cols) by a VMEM byte budget (padded layout)."""
    sub = _sublane_multiple(dtype)
    itemsize = jnp.dtype(dtype).itemsize
    budget = _PER_BUFFER_BYTES

    # VMEM footprint of an (r, c) block is padded to
    # (round_up(r, sub), round_up(c, 128)) — account for that, not logical bytes.
    lane_w = _round_up(width, 128)

    # Column-tile only if even a minimum-height, full-width block would blow
    # the per-buffer budget (very wide W).  Column tiles must be 128-multiples.
    if sub * lane_w * itemsize > budget and width > 128:
        tile_cols = max(128, ((budget // (sub * itemsize)) // 128) * 128)
        tile_cols = min(tile_cols, (width // 128) * 128)
    else:
        tile_cols = width
    lane_w = _round_up(tile_cols, 128)

    # Row tile sized by BYTES (no fixed row cap), so narrow widths still get
    # ~2 MiB blocks instead of being starved by a hard row limit.
    t_max = max(sub, budget // max(1, lane_w * itemsize))
    t_max = min(t_max, rows)

    # Give v7x's two TensorCores something to split once the array is
    # non-trivial; an extra ~0.35 us grid step elsewhere is noise.
    total_bytes = rows * width * itemsize
    min_steps = 2 if (total_bytes > (1 << 20) and rows >= 2 * sub) else 1

    n_steps = max(min_steps, _cdiv(rows, t_max))
    if n_steps <= 1:
        return rows, tile_cols            # full-dim block: always layout-legal

    # Balance the tiles so the last grid step isn't nearly empty; round up to
    # the sublane packing multiple (slight <25% budget overshoot is fine).
    tile_rows = min(rows, _round_up(_cdiv(rows, n_steps), sub))
    return tile_rows, tile_cols


def _tiled_add_bias_2d(x2d: jax.Array, bias_row: jax.Array) -> jax.Array:
    rows, width = x2d.shape
    tile_rows, tile_cols = _choose_tiles(rows, width, x2d.dtype)
    grid = (pl.cdiv(rows, tile_rows), pl.cdiv(width, tile_cols))
    return pl.pallas_call(
        _add_bias_kernel,
        out_shape=jax.ShapeDtypeStruct((rows, width), x2d.dtype),
        grid=grid,
        in_specs=[
            pl.BlockSpec((tile_rows, tile_cols), lambda i, j: (i, j)),
            # Constant row-block: the bias slice stays VMEM-resident across the
            # row axis (re-fetched only when the column block changes).
            pl.BlockSpec((1, tile_cols), lambda i, j: (0, j)),
        ],
        out_specs=pl.BlockSpec((tile_rows, tile_cols), lambda i, j: (i, j)),
        compiler_params=pltpu.CompilerParams(
            # Pure map: both axes shardable across v7x's two TensorCores.
            dimension_semantics=("parallel", "parallel"),
        ),
    )(x2d, bias_row)


def _choose_fold(n: int, c: int) -> int:
    """Largest k that DIVIDES n with k*c <= ~4096 lanes; prefer k*c % 128 == 0.

    Returns 0 if no worthwhile fold factor exists (caller runs unfolded)."""
    k_min = 128 // math.gcd(c, 128)           # smallest k with k*c % 128 == 0
    k_cap = min(n, max(k_min, 4096 // max(1, c)))
    best_unaligned = 0
    for cand in range(k_cap, 1, -1):
        if n % cand:
            continue
        if (cand * c) % 128 == 0:
            return cand                        # lane-aligned: fully unmasked vst
        if not best_unaligned and cand * c >= 512:
            best_unaligned = cand              # wide fold: at most 1 masked vreg/row
    return best_unaligned


def _add_bias_2d(x2d: jax.Array, bias_row: jax.Array) -> jax.Array:
    n, c = x2d.shape
    itemsize = jnp.dtype(x2d.dtype).itemsize

    # Already (nearly) lane-dense: tile directly over rows/columns.
    if c % 128 == 0 or c >= 1024:
        return _tiled_add_bias_2d(x2d, bias_row)

    # Tiny inputs: launch overhead dominates; one full-array block is simplest
    # and avoids any reshape/tile plumbing.
    if n * c * itemsize <= _SMALL_BYTES:
        return _tiled_add_bias_2d(x2d, bias_row)

    # Lane-dense folding without padding: pick k dividing n so k consecutive
    # rows become one row of width k*c (row-major reshape of the FULL array is
    # free — no jnp.pad copy, no prefix/tail stitch).
    k = _choose_fold(n, c)
    if k:
        x_folded = x2d.reshape(n // k, k * c)
        bias_folded = jnp.tile(bias_row, (1, k))        # (1, k*c), tiny
        return _tiled_add_bias_2d(x_folded, bias_folded).reshape(n, c)

    # No usable divisor fold: run unfolded.  HBM DMAs remain contiguous (the
    # block spans the whole width); only the on-chip lane-masked store path is
    # wasteful, and it has >=2x headroom over HBM bandwidth.
    return _tiled_add_bias_2d(x2d, bias_row)


def add_bias(x: jax.Array, bias: jax.Array) -> jax.Array:
    """Forward of AddBias.  x: (..., C); bias: (C, 1) parameter as stored by
    the PyTorch module (bias.unsqueeze(1))."""
    c = bias.shape[0]
    # PyTorch glue: bias.t().view(1, -1) -> (1, C)
    bias_row = jnp.reshape(jnp.transpose(bias), (1, c)).astype(x.dtype)

    if x.ndim == 1:
        x = x[None, :]            # PyTorch broadcast result shape is (1, C)
    orig_shape = x.shape
    x2d = x.reshape(-1, c)        # row-major: free reshape of leading dims
    out2d = _add_bias_2d(x2d, bias_row)
    return out2d.reshape(orig_shape)


if __name__ == "__main__":
    key = jax.random.PRNGKey(0)
    kb, kx1, kx2, kx3, kx4, kb2 = jax.random.split(key, 6)

    # --- Case 1: module-sized shapes (batch=4, hidden=32; C < 128, tiny path) ---
    batch, hidden = 4, 32
    bias_vec = jax.random.normal(kb, (hidden,), dtype=jnp.float32)
    bias_param = bias_vec[:, None]                       # (C, 1), like unsqueeze(1)
    x1 = jax.random.normal(kx1, (batch, hidden), dtype=jnp.float32)
    out1 = jax.block_until_ready(add_bias(x1, bias_param))
    assert out1.shape == x1.shape and out1.dtype == x1.dtype
    assert jnp.allclose(out1, x1 + bias_vec[None, :], atol=1e-6, rtol=1e-6)

    # --- Case 2: lane-dense C (multiple of 128), awkward N ---
    bias_vec2 = jax.random.normal(kb2, (256,), dtype=jnp.float32)
    x2 = jax.random.normal(kx2, (300, 256), dtype=jnp.float32)
    out2 = jax.block_until_ready(add_bias(x2, bias_vec2[:, None]))
    assert jnp.allclose(out2, x2 + bias_vec2[None, :], atol=1e-6, rtol=1e-6)

    # --- Case 3: tiny N not divisible by the minimum fold factor ---
    x3 = jax.random.normal(kx3, (5, hidden), dtype=jnp.float32)
    out3 = jax.block_until_ready(add_bias(x3, bias_param))
    assert out3.shape == (5, hidden)
    assert jnp.allclose(out3, x3 + bias_vec[None, :], atol=1e-6, rtol=1e-6)

    # --- Case 4: larger N exercising divisor folding + multi-step parallel grid ---
    x4 = jax.random.normal(kx4, (16384, hidden), dtype=jnp.float32)
    out4 = jax.block_until_ready(add_bias(x4, bias_param))
    assert jnp.allclose(out4, x4 + bias_vec[None, :], atol=1e-6, rtol=1e-6)

    print("KERNEL_OK")
</pallas_src>

<mosaic_0001>
module attributes {stable_mosaic.version = 11 : i64} {
  func.func @_add_bias_kernel(%arg0: i32, %arg1: i32, %arg2: memref<4x32xf32, #tpu.memory_space<vmem>>, %arg3: memref<1x32xf32, #tpu.memory_space<vmem>>, %arg4: memref<4x32xf32, #tpu.memory_space<vmem>>) attributes {dimension_semantics = [#tpu.dimension_semantics<parallel>, #tpu.dimension_semantics<parallel>], iteration_bounds = array<i64: 1, 1>, scalar_prefetch = 0 : i64, scratch_operands = 0 : i64, tpu.core_type = #tpu.core_type<tc>, window_params = [{transform_indices = @transform_0, window_bounds = array<i64: 4, 32>}, {transform_indices = @transform_1, window_bounds = array<i64: 1, 32>}, {transform_indices = @transform_2, window_bounds = array<i64: 4, 32>}]} {
    %c0 = arith.constant 0 : index
    %c0_0 = arith.constant 0 : index
    %0 = vector.load %arg2[%c0, %c0_0] : memref<4x32xf32, #tpu.memory_space<vmem>>, vector<4x32xf32>
    %c0_1 = arith.constant 0 : index
    %c0_2 = arith.constant 0 : index
    %1 = vector.load %arg3[%c0_1, %c0_2] : memref<1x32xf32, #tpu.memory_space<vmem>>, vector<1x32xf32>
    %2 = vector.broadcast %1 : vector<1x32xf32> to vector<4x32xf32>
    %3 = arith.addf %0, %2 : vector<4x32xf32>
    %c0_3 = arith.constant 0 : index
    %c0_4 = arith.constant 0 : index
    %4 = vector.load %arg4[%c0_3, %c0_4] : memref<4x32xf32, #tpu.memory_space<vmem>>, vector<4x32xf32>
    tpu.vector_store %arg4[%c0_3, %c0_4], %3 {strides = array<i32>} : memref<4x32xf32, #tpu.memory_space<vmem>>, vector<4x32xf32>,
    return
  }
  func.func @transform_0(%arg0: i32, %arg1: i32) -> (i32, i32) {
    %c0_i32 = arith.constant 0 : i32
    return %arg0, %arg1 : i32, i32
  }
  func.func @transform_1(%arg0: i32, %arg1: i32) -> (i32, i32) {
    %c0_i32 = arith.constant 0 : i32
    %c0_i32_0 = arith.constant 0 : i32
    return %c0_i32, %arg1 : i32, i32
  }
  func.func @transform_2(%arg0: i32, %arg1: i32) -> (i32, i32) {
    %c0_i32 = arith.constant 0 : i32
    return %arg0, %arg1 : i32, i32
  }
}

</mosaic_0001>

<bundles_post_ra>
// kernel: tpu_custom_call.1
= control target key start
LH: loop header
LB: loop body
LE: loop exit
PB: predicated region body
PF: predicated region fallthrough
CT: control target
= control target key end

     0   :  { %7 = vsyncpa [#allocation3], 0  ;;  %s175_s0 = inlined_call_operand.hbm [shape: f32[4,32], index: 0, kind: input, shape index: {}]   ;;  %s176_s1 = inlined_call_operand.hbm [shape: f32[1,32], index: 1, kind: input, shape index: {}]   ;;  %s177_s2 = inlined_call_operand.hbm [shape: f32[4,32], index: 2, kind: output, shape index: {}]  }
   0x1   :  { %8 = vsyncpa [#allocation6], 0 }
   0x2   :  { %9 = vsyncpa [#allocation4], 0  ;;  %s15_s11 = sshll.u32 %s175_s0, 4  ;;  %s148_s12 = smov [#allocation2]   ;;  %s16_s11 = int_to_ptr.hbm [resolvable:$true] %s15_s11 }
   0x3   :  { %s17_s13 = sshll.u32 %s148_s12, 4  ;;  %s26_s16 = sshll.u32 %s176_s1, 4  ;;  %s18_s13 = int_to_ptr.vmem [resolvable:$true] %s17_s13  ;;  %s27_s16 = int_to_ptr.hbm [resolvable:$true] %s26_s16 }
   0x4   :  { %20 = dma.hbm_to_vmem [thread:$0]  %s16_s11, 64, %s18_s13, [#allocation3]  }
   0x5   :  { %s149_s17 = smov [#allocation5]  }
   0x6   :  { %s28_s18 = sshll.u32 %s149_s17, 4  ;;  %s29_s18 = int_to_ptr.vmem [resolvable:$true] %s28_s18 }
   0x7   :  { %31 = dma.hbm_to_vmem [thread:$0]  %s27_s16, 16, %s29_s18, [#allocation6]  }
   0x8   :  { %142 = dma.done.wait [#allocation3], 64  }
   0x9   :  { %143 = vsyncadd [#allocation3], 4294967232 }
   0xa   :  { %144 = dma.done.wait [#allocation6], 16  }
   0xb   :  { %145 = vsyncadd [#allocation6], 4294967280  ;;  %s150_s19 = smov [#allocation7]   ;;  %s55_s22 = sshll.u32 %s177_s2, 4  ;;  %v40_v0 = vld [vmem:[#allocation2] sm:$0xf]  ;;  %s56_s22 = int_to_ptr.hbm [resolvable:$true] %s55_s22 }
   0xc   :  { %s53_s0 = sshll.u32 %s150_s19, 4  ;;  %v69_v1 = vld [vmem:[#allocation5] ss:$0 sm:$0xff]  ;;  %vm46_vm0 = vcmask 257024   ;;  %s54_s0 = int_to_ptr.vmem [resolvable:$true] %s53_s0 }
   0xd   :  { %v45_v2 = vadd.f32 %v69_v1, %v40_v0 }
   0xf   :  { %47 = vst.msk [vmem:[#allocation7] sm:$0xf] %vm46_vm0, %v45_v2 }
  0x10   :  { %58 = dma.vmem_to_hbm [thread:$0]  %s54_s0, 64, %s56_s22, [#allocation4]  }
  0x11   :  { %146 = dma.done.wait [#allocation4], 64  }
  0x12   :  { %147 = vsyncadd [#allocation4], 4294967232 }
  0x13   :  { %63 = vsyncpa [#allocation3], 1 }
  0x14   :  { %64 = vsyncpa [#allocation6], 1 }
  0x15   :  { %65 = vsyncpa [#allocation4], 1 }

</bundles_post_ra>
